<compile_context>
chip_gen: v6e
topology: v6e:2x2x1
jax: 0.10.0
libtpu: 0.0.40
codegen_flags: <defaults>
</compile_context>

<pallas_src>
import functools
import math

import jax
import jax.numpy as jnp
import numpy as np
from jax.experimental import pallas as pl
from jax.experimental.pallas import tpu as pltpu

NEG_INF = -1e9  # additive mask value; finite so fully-masked rows stay NaN-free
                # (torch SDPA would produce NaN there).


# --------------------------------------------------------------------------- RoPE tables

def _rope_angles(seq_len, head_dim, base):
    """Per-pair cos/sin tables (seq_len, head_dim//2), float64 -> float32."""
    half = head_dim // 2
    i = np.arange(half, dtype=np.float64)
    theta = 1.0 / (base ** (2.0 * i / head_dim))        # torchtune convention
    pos = np.arange(seq_len, dtype=np.float64)
    ang = np.outer(pos, theta)                          # (T, hd/2)
    return np.cos(ang), np.sin(ang)


def _rope_cos_sin_packed(seq_len, head_dim, base, n_head):
    """Packed [cos | sin] table of shape (T, 4*D) for the concatenated [q|k] slab.

    cos/sin are duplicated per interleaved pair (-> (T, hd)), tiled across heads (-> (T, D))
    and tiled again for the q and k halves (-> (T, 2*D)); cos and sin are concatenated along
    lanes so the kernel needs a single input / single DMA.
    """
    cos, sin = _rope_angles(seq_len, head_dim, base)
    cos = np.tile(np.repeat(cos, 2, axis=-1), (1, 2 * n_head))   # (T, 2*D)
    sin = np.tile(np.repeat(sin, 2, axis=-1), (1, 2 * n_head))   # (T, 2*D)
    return jnp.asarray(np.concatenate([cos, sin], axis=-1), jnp.float32)  # (T, 4*D)


# --------------------------------------------------------------------------- fused kernel

def _self_attn_kernel(*refs, n_head, head_dim, causal, fused_qkv):
    if causal:
        xq_ref, xk_ref, xv_ref, wqkv_ref, wo_ref, cs_ref, o_ref = refs
        mask_ref = None
    else:
        xq_ref, xk_ref, xv_ref, wqkv_ref, wo_ref, cs_ref, mask_ref, o_ref = refs

    xq = xq_ref[0]                                   # (T, D) f32
    T, D = xq.shape
    H, hd = n_head, head_dim

    wqkv = wqkv_ref[...].astype(jnp.bfloat16)        # (D, 3D) [Wq | Wk | Wv]
    if fused_qkv:
        # self-attention path: q, k, v all come from the same input -> one (T,D)x(D,3D) matmul
        qkv = jnp.dot(xq.astype(jnp.bfloat16), wqkv, preferred_element_type=jnp.float32)
        q, k, v = qkv[:, :D], qkv[:, D:2 * D], qkv[:, 2 * D:]
    else:
        # distinct q/k/v source tensors (still one kernel, three matmuls)
        q = jnp.dot(xq.astype(jnp.bfloat16), wqkv[:, :D],
                    preferred_element_type=jnp.float32)
        k = jnp.dot(xk_ref[0].astype(jnp.bfloat16), wqkv[:, D:2 * D],
                    preferred_element_type=jnp.float32)
        v = jnp.dot(xv_ref[0].astype(jnp.bfloat16), wqkv[:, 2 * D:],
                    preferred_element_type=jnp.float32)

    # ---- RoPE on the concatenated [q | k] slab (T, 2D) in a single pass (f32, no MXU) ----
    # interleaved-pair rotation: out[2i] = x[2i]*cos_i - x[2i+1]*sin_i
    #                            out[2i+1] = x[2i+1]*cos_i + x[2i]*sin_i
    qk = jnp.concatenate([q, k], axis=-1)            # (T, 2D)
    two_d = 2 * D
    cos = cs_ref[:, :two_d]
    sin = cs_ref[:, two_d:]
    left = pltpu.roll(qk, shift=two_d - 1, axis=1)   # element j <- qk[j+1]  (XLU rotate)
    right = pltpu.roll(qk, shift=1, axis=1)          # element j <- qk[j-1]
    lane = jax.lax.broadcasted_iota(jnp.int32, qk.shape, 1)
    pair_rot = jnp.where((lane % 2) == 0, -left, right)
    qk = qk * cos + pair_rot * sin
    q, k = qk[:, :D], qk[:, D:]

    # ---- head-batched attention: heads stacked on a leading batch dim ----
    qh = jnp.stack([q[:, h * hd:(h + 1) * hd] for h in range(H)], axis=0).astype(jnp.bfloat16)
    kh = jnp.stack([k[:, h * hd:(h + 1) * hd] for h in range(H)], axis=0).astype(jnp.bfloat16)
    vh = jnp.stack([v[:, h * hd:(h + 1) * hd] for h in range(H)], axis=0).astype(jnp.bfloat16)

    scale = 1.0 / math.sqrt(hd)
    s = jax.lax.dot_general(qh, kh, (((2,), (2,)), ((0,), (0,))),
                            preferred_element_type=jnp.float32) * scale      # (H, T, T)

    if causal:
        row = jax.lax.broadcasted_iota(jnp.int32, (T, T), 0)
        col = jax.lax.broadcasted_iota(jnp.int32, (T, T), 1)
        m = jnp.where(col <= row, 0.0, NEG_INF).astype(jnp.float32)
    else:
        m = mask_ref[0]                              # (T, T) additive mask for this batch row
    s = s + m[None, :, :]

    # one softmax pass over all heads at once
    s = s - jnp.max(s, axis=-1, keepdims=True)
    p = jnp.exp(s)
    p = p / jnp.sum(p, axis=-1, keepdims=True)

    pv = jax.lax.dot_general(p.astype(jnp.bfloat16), vh, (((2,), (1,)), ((0,), (0,))),
                             preferred_element_type=jnp.float32)             # (H, T, hd)
    attn = jnp.concatenate([pv[h] for h in range(H)], axis=-1)               # (T, D)

    y = jnp.dot(attn.astype(jnp.bfloat16), wo_ref[...].astype(jnp.bfloat16),
                preferred_element_type=jnp.float32)
    o_ref[0] = y


def self_attention(x_q, x_k, x_v, wq, wk, wv, wo, *, n_head,
                   attn_mask=None, rope_base=10000.0):
    """Pallas implementation of SelfAttention.forward (no kv_cache, qT == kT).

    Weights are stored transposed w.r.t. torch nn.Linear: (D_in, D_out), so y = x @ W.
    attn_mask: None -> causal; bool (B,T,T) True=attend; or additive float (B,T,T).
    """
    B, T, D = x_q.shape
    assert x_k.shape == (B, T, D) and x_v.shape == (B, T, D), \
        "only qT == kT (no kv_cache) is supported"  # TODO(synk): cached / qT!=kT path
    assert D % n_head == 0
    hd = D // n_head

    fused = (x_q is x_k) and (x_k is x_v)            # self-attention fast path
    wqkv = jnp.concatenate([wq, wk, wv], axis=1)     # (D, 3D), single weight DMA
    cs = _rope_cos_sin_packed(T, hd, rope_base, n_head)   # (T, 4D) packed [cos | sin]
    causal = attn_mask is None

    kern = functools.partial(_self_attn_kernel, n_head=n_head, head_dim=hd,
                             causal=causal, fused_qkv=fused)

    in_specs = [
        pl.BlockSpec((1, T, D), lambda b: (b, 0, 0)),        # x_q
        pl.BlockSpec((1, T, D), lambda b: (b, 0, 0)),        # x_k
        pl.BlockSpec((1, T, D), lambda b: (b, 0, 0)),        # x_v
        pl.BlockSpec((D, 3 * D), lambda b: (0, 0)),          # fused [Wq|Wk|Wv]
        pl.BlockSpec((D, D), lambda b: (0, 0)),              # Wo
        pl.BlockSpec((T, 4 * D), lambda b: (0, 0)),          # packed cos|sin
    ]
    operands = [x_q, x_k, x_v, wqkv, wo, cs]

    if not causal:
        if attn_mask.dtype == jnp.bool_:
            add_mask = jnp.where(attn_mask, 0.0, NEG_INF).astype(jnp.float32)
        else:
            add_mask = attn_mask.astype(jnp.float32)
        in_specs.append(pl.BlockSpec((1, T, T), lambda b: (b, 0, 0)))
        operands.append(add_mask)

    return pl.pallas_call(
        kern,
        out_shape=jax.ShapeDtypeStruct((B, T, D), jnp.float32),
        grid=(B,),
        in_specs=in_specs,
        out_specs=pl.BlockSpec((1, T, D), lambda b: (b, 0, 0)),
        # batch rows are independent -> "parallel" lets v7x shard across its 2 TensorCores
        compiler_params=pltpu.CompilerParams(dimension_semantics=("parallel",)),
    )(*operands)


# --------------------------------------------------------------------------- pure-JAX reference

def _reference(x_q, x_k, x_v, wq, wk, wv, wo, *, n_head, attn_mask, rope_base=10000.0):
    B, T, D = x_q.shape
    hd = D // n_head
    half = hd // 2
    q = x_q @ wq
    k = x_k @ wk
    v = x_v @ wv

    cos_np, sin_np = _rope_angles(T, hd, rope_base)
    cos = jnp.asarray(cos_np, jnp.float32)[None, :, None, :]    # (1, T, 1, hd/2)
    sin = jnp.asarray(sin_np, jnp.float32)[None, :, None, :]

    def rope(t):
        t = t.reshape(B, T, n_head, half, 2)
        t0, t1 = t[..., 0], t[..., 1]
        r0 = t0 * cos - t1 * sin
        r1 = t1 * cos + t0 * sin
        return jnp.stack([r0, r1], axis=-1).reshape(B, T, D)

    q = rope(q)
    k = rope(k)

    qh = q.reshape(B, T, n_head, hd).transpose(0, 2, 1, 3)
    kh = k.reshape(B, T, n_head, hd).transpose(0, 2, 1, 3)
    vh = v.reshape(B, T, n_head, hd).transpose(0, 2, 1, 3)
    s = jnp.einsum('bhqd,bhkd->bhqk', qh, kh) / math.sqrt(hd)
    if attn_mask is None:
        keep = jnp.tril(jnp.ones((T, T), bool))[None, None]
    else:
        keep = attn_mask[:, None, :, :]
    s = jnp.where(keep, s, NEG_INF)
    p = jax.nn.softmax(s, axis=-1)
    o = jnp.einsum('bhqk,bhkd->bhqd', p, vh).transpose(0, 2, 1, 3).reshape(B, T, D)
    return o @ wo


# --------------------------------------------------------------------------- main

if __name__ == "__main__":
    B, T, D, H = 2, 8, 64, 4     # n_dim=64, n_head=4 as in REPLConfig; small seq
    root = jax.random.PRNGKey(0)
    kx, kq, kk, kv, ko = jax.random.split(root, 5)
    x = jax.random.normal(kx, (B, T, D), jnp.float32)
    wscale = 1.0 / math.sqrt(D)
    wq = wscale * jax.random.normal(kq, (D, D), jnp.float32)
    wk = wscale * jax.random.normal(kk, (D, D), jnp.float32)
    wv = wscale * jax.random.normal(kv, (D, D), jnp.float32)
    wo = wscale * jax.random.normal(ko, (D, D), jnp.float32)

    # 1) attn_mask=None -> is_causal=True in the reference forward
    y_causal = self_attention(x, x, x, wq, wk, wv, wo, n_head=H)
    jax.block_until_ready(y_causal)
    y_causal_ref = _reference(x, x, x, wq, wk, wv, wo, n_head=H, attn_mask=None)
    np.testing.assert_allclose(np.asarray(y_causal), np.asarray(y_causal_ref),
                               rtol=7e-2, atol=7e-2)

    # 2) explicit boolean key-padding mask (True = attend); every query row keeps >= 1 key,
    #    so results stay finite (torch would NaN on fully-masked rows).
    lens = jnp.array([T, T - 3], jnp.int32)
    valid = jnp.arange(T)[None, :] < lens[:, None]                   # (B, T)
    attn_mask = jnp.broadcast_to(valid[:, None, :], (B, T, T))
    y_masked = self_attention(x, x, x, wq, wk, wv, wo, n_head=H, attn_mask=attn_mask)
    jax.block_until_ready(y_masked)
    y_masked_ref = _reference(x, x, x, wq, wk, wv, wo, n_head=H, attn_mask=attn_mask)
    np.testing.assert_allclose(np.asarray(y_masked), np.asarray(y_masked_ref),
                               rtol=7e-2, atol=7e-2)

    assert y_causal.shape == (B, T, D) and y_masked.shape == (B, T, D)
    assert bool(jnp.all(jnp.isfinite(y_causal))) and bool(jnp.all(jnp.isfinite(y_masked)))
    print("KERNEL_OK")
</pallas_src>

<mosaic_0001>
module attributes {stable_mosaic.version = 11 : i64} {
  func.func @_self_attn_kernel(%arg0: i32, %arg1: memref<1x8x64xf32, #tpu.memory_space<vmem>>, %arg2: memref<1x8x64xf32, #tpu.memory_space<vmem>>, %arg3: memref<1x8x64xf32, #tpu.memory_space<vmem>>, %arg4: memref<64x192xf32, #tpu.memory_space<vmem>>, %arg5: memref<64x64xf32, #tpu.memory_space<vmem>>, %arg6: memref<8x256xf32, #tpu.memory_space<vmem>>, %arg7: memref<1x8x64xf32, #tpu.memory_space<vmem>>) attributes {dimension_semantics = [#tpu.dimension_semantics<parallel>], iteration_bounds = array<i64: 2>, scalar_prefetch = 0 : i64, scratch_operands = 0 : i64, tpu.core_type = #tpu.core_type<tc>, window_params = [{transform_indices = @transform_0, window_bounds = array<i64: 1, 8, 64>}, {transform_indices = @transform_1, window_bounds = array<i64: 1, 8, 64>}, {transform_indices = @transform_2, window_bounds = array<i64: 1, 8, 64>}, {pipeline_mode = #tpu.pipeline_mode<synchronous>, transform_indices = @transform_3, window_bounds = array<i64: 64, 192>}, {pipeline_mode = #tpu.pipeline_mode<synchronous>, transform_indices = @transform_4, window_bounds = array<i64: 64, 64>}, {pipeline_mode = #tpu.pipeline_mode<synchronous>, transform_indices = @transform_5, window_bounds = array<i64: 8, 256>}, {transform_indices = @transform_6, window_bounds = array<i64: 1, 8, 64>}]} {
    %c0 = arith.constant 0 : index
    %c0_0 = arith.constant 0 : index
    %c0_1 = arith.constant 0 : index
    %0 = vector.load %arg1[%c0, %c0_0, %c0_1] : memref<1x8x64xf32, #tpu.memory_space<vmem>>, vector<1x8x64xf32>
    %1 = vector.shape_cast %0 : vector<1x8x64xf32> to vector<8x64xf32>
    %c0_2 = arith.constant 0 : index
    %c0_3 = arith.constant 0 : index
    %2 = vector.load %arg4[%c0_2, %c0_3] : memref<64x192xf32, #tpu.memory_space<vmem>>, vector<64x192xf32>
    %3 = arith.truncf %2 : vector<64x192xf32> to vector<64x192xbf16>
    %4 = arith.truncf %1 : vector<8x64xf32> to vector<8x64xbf16>
    %cst = arith.constant dense<0.000000e+00> : vector<8x192xf32>
    %5 = tpu.matmul %4, %3, %cst {dimension_numbers = #tpu.dot_dimension_numbers<[1], [0], [0], [1], [0, 0, 1, 1], [], []>} : vector<8x64xbf16>, vector<64x192xbf16>, vector<8x192xf32> -> vector<8x192xf32>
    %6 = vector.extract_strided_slice %5 {offsets = [0, 0], sizes = [8, 64], strides = [1, 1]} : vector<8x192xf32> to vector<8x64xf32>
    %7 = vector.extract_strided_slice %5 {offsets = [0, 64], sizes = [8, 64], strides = [1, 1]} : vector<8x192xf32> to vector<8x64xf32>
    %8 = vector.extract_strided_slice %5 {offsets = [0, 128], sizes = [8, 64], strides = [1, 1]} : vector<8x192xf32> to vector<8x64xf32>
    %9 = tpu.concatenate %6, %7 in 1 : vector<8x64xf32>, vector<8x64xf32> -> vector<8x128xf32>
    %c0_4 = arith.constant 0 : index
    %c0_5 = arith.constant 0 : index
    %10 = vector.load %arg6[%c0_4, %c0_5] : memref<8x256xf32, #tpu.memory_space<vmem>>, vector<8x128xf32>
    %c0_6 = arith.constant 0 : index
    %c128 = arith.constant 128 : index
    %11 = vector.load %arg6[%c0_6, %c128] : memref<8x256xf32, #tpu.memory_space<vmem>>, vector<8x128xf32>
    %c127_i32 = arith.constant 127 : i32
    %12 = tpu.dynamic_rotate %9 by %c127_i32 dim 1 : vector<8x128xf32>, i32 -> vector<8x128xf32>
    %c1_i32 = arith.constant 1 : i32
    %13 = tpu.dynamic_rotate %9 by %c1_i32 dim 1 : vector<8x128xf32>, i32 -> vector<8x128xf32>
    %14 = tpu.iota {dimensions = array<i32: 1>} : vector<8x128xi32>
    %c2_i32 = arith.constant 2 : i32
    %c0_i32 = arith.constant 0 : i32
    %15 = arith.cmpi eq, %c2_i32, %c0_i32 : i32
    %c1_i32_7 = arith.constant 1 : i32
    %16 = arith.select %15, %c1_i32_7, %c2_i32 : i32
    %17 = vector.broadcast %16 : i32 to vector<8x128xi32>
    %18 = arith.remsi %14, %17 : vector<8x128xi32>
    %c0_i32_8 = arith.constant 0 : i32
    %19 = vector.broadcast %c0_i32_8 : i32 to vector<8x128xi32>
    %20 = arith.cmpi ne, %18, %19 : vector<8x128xi32>
    %c0_i32_9 = arith.constant 0 : i32
    %21 = vector.broadcast %c0_i32_9 : i32 to vector<8x128xi32>
    %22 = arith.cmpi slt, %18, %21 : vector<8x128xi32>
    %c0_i32_10 = arith.constant 0 : i32
    %23 = arith.cmpi slt, %16, %c0_i32_10 : i32
    %24 = vector.broadcast %23 : i1 to vector<8x128xi1>
    %25 = vector.broadcast %24 : vector<8x128xi1> to vector<8x128xi1>
    %26 = arith.xori %22, %25 : vector<8x128xi1>
    %27 = arith.andi %26, %20 : vector<8x128xi1>
    %28 = vector.broadcast %16 : i32 to vector<8x128xi32>
    %29 = arith.addi %18, %28 : vector<8x128xi32>
    %30 = arith.select %27, %29, %18 : vector<8x128xi1>, vector<8x128xi32>
    %c0_i32_11 = arith.constant 0 : i32
    %31 = vector.broadcast %c0_i32_11 : i32 to vector<8x128xi32>
    %32 = arith.cmpi eq, %30, %31 : vector<8x128xi32>
    %cst_12 = arith.constant 0.000000e+00 : f32
    %33 = vector.broadcast %cst_12 : f32 to vector<8x128xf32>
    %34 = arith.subf %33, %12 : vector<8x128xf32>
    %35 = arith.select %32, %34, %13 : vector<8x128xi1>, vector<8x128xf32>
    %36 = arith.mulf %9, %10 : vector<8x128xf32>
    %37 = arith.mulf %35, %11 : vector<8x128xf32>
    %38 = arith.addf %36, %37 : vector<8x128xf32>
    %39 = vector.extract_strided_slice %38 {offsets = [0, 0], sizes = [8, 64], strides = [1, 1]} : vector<8x128xf32> to vector<8x64xf32>
    %40 = vector.extract_strided_slice %38 {offsets = [0, 64], sizes = [8, 64], strides = [1, 1]} : vector<8x128xf32> to vector<8x64xf32>
    %41 = vector.extract_strided_slice %39 {offsets = [0, 0], sizes = [8, 16], strides = [1, 1]} : vector<8x64xf32> to vector<8x16xf32>
    %42 = vector.extract_strided_slice %39 {offsets = [0, 16], sizes = [8, 16], strides = [1, 1]} : vector<8x64xf32> to vector<8x16xf32>
    %43 = vector.extract_strided_slice %39 {offsets = [0, 32], sizes = [8, 16], strides = [1, 1]} : vector<8x64xf32> to vector<8x16xf32>
    %44 = vector.extract_strided_slice %39 {offsets = [0, 48], sizes = [8, 16], strides = [1, 1]} : vector<8x64xf32> to vector<8x16xf32>
    %45 = vector.shape_cast %41 : vector<8x16xf32> to vector<1x8x16xf32>
    %46 = vector.shape_cast %42 : vector<8x16xf32> to vector<1x8x16xf32>
    %47 = vector.shape_cast %43 : vector<8x16xf32> to vector<1x8x16xf32>
    %48 = vector.shape_cast %44 : vector<8x16xf32> to vector<1x8x16xf32>
    %49 = tpu.concatenate %45, %46, %47, %48 in 0 : vector<1x8x16xf32>, vector<1x8x16xf32>, vector<1x8x16xf32>, vector<1x8x16xf32> -> vector<4x8x16xf32>
    %50 = arith.truncf %49 : vector<4x8x16xf32> to vector<4x8x16xbf16>
    %51 = vector.extract_strided_slice %40 {offsets = [0, 0], sizes = [8, 16], strides = [1, 1]} : vector<8x64xf32> to vector<8x16xf32>
    %52 = vector.extract_strided_slice %40 {offsets = [0, 16], sizes = [8, 16], strides = [1, 1]} : vector<8x64xf32> to vector<8x16xf32>
    %53 = vector.extract_strided_slice %40 {offsets = [0, 32], sizes = [8, 16], strides = [1, 1]} : vector<8x64xf32> to vector<8x16xf32>
    %54 = vector.extract_strided_slice %40 {offsets = [0, 48], sizes = [8, 16], strides = [1, 1]} : vector<8x64xf32> to vector<8x16xf32>
    %55 = vector.shape_cast %51 : vector<8x16xf32> to vector<1x8x16xf32>
    %56 = vector.shape_cast %52 : vector<8x16xf32> to vector<1x8x16xf32>
    %57 = vector.shape_cast %53 : vector<8x16xf32> to vector<1x8x16xf32>
    %58 = vector.shape_cast %54 : vector<8x16xf32> to vector<1x8x16xf32>
    %59 = tpu.concatenate %55, %56, %57, %58 in 0 : vector<1x8x16xf32>, vector<1x8x16xf32>, vector<1x8x16xf32>, vector<1x8x16xf32> -> vector<4x8x16xf32>
    %60 = arith.truncf %59 : vector<4x8x16xf32> to vector<4x8x16xbf16>
    %61 = vector.extract_strided_slice %8 {offsets = [0, 0], sizes = [8, 16], strides = [1, 1]} : vector<8x64xf32> to vector<8x16xf32>
    %62 = vector.extract_strided_slice %8 {offsets = [0, 16], sizes = [8, 16], strides = [1, 1]} : vector<8x64xf32> to vector<8x16xf32>
    %63 = vector.extract_strided_slice %8 {offsets = [0, 32], sizes = [8, 16], strides = [1, 1]} : vector<8x64xf32> to vector<8x16xf32>
    %64 = vector.extract_strided_slice %8 {offsets = [0, 48], sizes = [8, 16], strides = [1, 1]} : vector<8x64xf32> to vector<8x16xf32>
    %65 = vector.shape_cast %61 : vector<8x16xf32> to vector<1x8x16xf32>
    %66 = vector.shape_cast %62 : vector<8x16xf32> to vector<1x8x16xf32>
    %67 = vector.shape_cast %63 : vector<8x16xf32> to vector<1x8x16xf32>
    %68 = vector.shape_cast %64 : vector<8x16xf32> to vector<1x8x16xf32>
    %69 = tpu.concatenate %65, %66, %67, %68 in 0 : vector<1x8x16xf32>, vector<1x8x16xf32>, vector<1x8x16xf32>, vector<1x8x16xf32> -> vector<4x8x16xf32>
    %70 = arith.truncf %69 : vector<4x8x16xf32> to vector<4x8x16xbf16>
    %cst_13 = arith.constant dense<0.000000e+00> : vector<4x8x8xf32>
    %71 = tpu.matmul %50, %60, %cst_13 {dimension_numbers = #tpu.dot_dimension_numbers<[2], [2], [1], [1], [0, 0, 0, 1, 1, 1], [0], [0]>} : vector<4x8x16xbf16>, vector<4x8x16xbf16>, vector<4x8x8xf32> -> vector<4x8x8xf32>
    %cst_14 = arith.constant 2.500000e-01 : f32
    %72 = vector.broadcast %cst_14 : f32 to vector<4x8x8xf32>
    %73 = arith.mulf %71, %72 : vector<4x8x8xf32>
    %74 = tpu.iota {dimensions = array<i32: 0>} : vector<8x8xi32>
    %75 = tpu.iota {dimensions = array<i32: 1>} : vector<8x8xi32>
    %76 = arith.cmpi sle, %75, %74 : vector<8x8xi32>
    %cst_15 = arith.constant 0.000000e+00 : f32
    %cst_16 = arith.constant -1.000000e+09 : f32
    %77 = vector.broadcast %cst_15 : f32 to vector<8x8xf32>
    %78 = vector.broadcast %cst_16 : f32 to vector<8x8xf32>
    %79 = arith.select %76, %77, %78 : vector<8x8xi1>, vector<8x8xf32>
    %80 = vector.shape_cast %79 : vector<8x8xf32> to vector<1x8x8xf32>
    %81 = vector.broadcast %80 : vector<1x8x8xf32> to vector<4x8x8xf32>
    %82 = arith.addf %73, %81 : vector<4x8x8xf32>
    %cst_17 = arith.constant dense<0xFF800000> : vector<4x8xf32>
    %83 = vector.multi_reduction <maximumf>, %82, %cst_17 [2] : vector<4x8x8xf32> to vector<4x8xf32>
    %84 = vector.shape_cast %83 : vector<4x8xf32> to vector<4x8x1xf32>
    %85 = vector.broadcast %84 : vector<4x8x1xf32> to vector<4x8x8xf32>
    %86 = arith.subf %82, %85 : vector<4x8x8xf32>
    %87 = math.exp %86 : vector<4x8x8xf32>
    %cst_18 = arith.constant dense<0.000000e+00> : vector<4x8xf32>
    %88 = vector.multi_reduction <add>, %87, %cst_18 [2] : vector<4x8x8xf32> to vector<4x8xf32>
    %89 = vector.shape_cast %88 : vector<4x8xf32> to vector<4x8x1xf32>
    %90 = vector.broadcast %89 : vector<4x8x1xf32> to vector<4x8x8xf32>
    %91 = arith.divf %87, %90 : vector<4x8x8xf32>
    %92 = arith.truncf %91 : vector<4x8x8xf32> to vector<4x8x8xbf16>
    %cst_19 = arith.constant dense<0.000000e+00> : vector<4x8x16xf32>
    %93 = tpu.matmul %92, %70, %cst_19 {dimension_numbers = #tpu.dot_dimension_numbers<[2], [1], [1], [2], [0, 0, 0, 1, 1, 2], [0], [0]>} : vector<4x8x8xbf16>, vector<4x8x16xbf16>, vector<4x8x16xf32> -> vector<4x8x16xf32>
    %94 = vector.extract_strided_slice %93 {offsets = [0, 0, 0], sizes = [1, 8, 16], strides = [1, 1, 1]} : vector<4x8x16xf32> to vector<1x8x16xf32>
    %95 = vector.shape_cast %94 : vector<1x8x16xf32> to vector<8x16xf32>
    %96 = vector.extract_strided_slice %93 {offsets = [1, 0, 0], sizes = [1, 8, 16], strides = [1, 1, 1]} : vector<4x8x16xf32> to vector<1x8x16xf32>
    %97 = vector.shape_cast %96 : vector<1x8x16xf32> to vector<8x16xf32>
    %98 = vector.extract_strided_slice %93 {offsets = [2, 0, 0], sizes = [1, 8, 16], strides = [1, 1, 1]} : vector<4x8x16xf32> to vector<1x8x16xf32>
    %99 = vector.shape_cast %98 : vector<1x8x16xf32> to vector<8x16xf32>
    %100 = vector.extract_strided_slice %93 {offsets = [3, 0, 0], sizes = [1, 8, 16], strides = [1, 1, 1]} : vector<4x8x16xf32> to vector<1x8x16xf32>
    %101 = vector.shape_cast %100 : vector<1x8x16xf32> to vector<8x16xf32>
    %102 = tpu.concatenate %95, %97, %99, %101 in 1 : vector<8x16xf32>, vector<8x16xf32>, vector<8x16xf32>, vector<8x16xf32> -> vector<8x64xf32>
    %103 = arith.truncf %102 : vector<8x64xf32> to vector<8x64xbf16>
    %c0_20 = arith.constant 0 : index
    %c0_21 = arith.constant 0 : index
    %104 = vector.load %arg5[%c0_20, %c0_21] : memref<64x64xf32, #tpu.memory_space<vmem>>, vector<64x64xf32>
    %105 = arith.truncf %104 : vector<64x64xf32> to vector<64x64xbf16>
    %cst_22 = arith.constant dense<0.000000e+00> : vector<8x64xf32>
    %106 = tpu.matmul %103, %105, %cst_22 {dimension_numbers = #tpu.dot_dimension_numbers<[1], [0], [0], [1], [0, 0, 1, 1], [], []>} : vector<8x64xbf16>, vector<64x64xbf16>, vector<8x64xf32> -> vector<8x64xf32>
    %c0_23 = arith.constant 0 : index
    %c0_24 = arith.constant 0 : index
    %c0_25 = arith.constant 0 : index
    %107 = vector.load %arg7[%c0_23, %c0_24, %c0_25] : memref<1x8x64xf32, #tpu.memory_space<vmem>>, vector<1x8x64xf32>
    %108 = vector.shape_cast %107 : vector<1x8x64xf32> to vector<8x64xf32>
    %109 = vector.shape_cast %106 : vector<8x64xf32> to vector<1x8x64xf32>
    tpu.vector_store %arg7[%c0_23, %c0_24, %c0_25], %109 {strides = array<i32>} : memref<1x8x64xf32, #tpu.memory_space<vmem>>, vector<1x8x64xf32>,
    return
  }
  func.func @transform_0(%arg0: i32) -> (i32, i32, i32) {
    %c0_i32 = arith.constant 0 : i32
    %c0_i32_0 = arith.constant 0 : i32
    %c0_i32_1 = arith.constant 0 : i32
    return %arg0, %c0_i32, %c0_i32_0 : i32, i32, i32
  }
  func.func @transform_1(%arg0: i32) -> (i32, i32, i32) {
    %c0_i32 = arith.constant 0 : i32
    %c0_i32_0 = arith.constant 0 : i32
    %c0_i32_1 = arith.constant 0 : i32
    return %arg0, %c0_i32, %c0_i32_0 : i32, i32, i32
  }
  func.func @transform_2(%arg0: i32) -> (i32, i32, i32) {
    %c0_i32 = arith.constant 0 : i32
    %c0_i32_0 = arith.constant 0 : i32
    %c0_i32_1 = arith.constant 0 : i32
    return %arg0, %c0_i32, %c0_i32_0 : i32, i32, i32
  }
  func.func @transform_3(%arg0: i32) -> (i32, i32) {
    %c0_i32 = arith.constant 0 : i32
    %c0_i32_0 = arith.constant 0 : i32
    %c0_i32_1 = arith.constant 0 : i32
    return %c0_i32, %c0_i32_0 : i32, i32
  }
  func.func @transform_4(%arg0: i32) -> (i32, i32) {
    %c0_i32 = arith.constant 0 : i32
    %c0_i32_0 = arith.constant 0 : i32
    %c0_i32_1 = arith.constant 0 : i32
    return %c0_i32, %c0_i32_0 : i32, i32
  }
  func.func @transform_5(%arg0: i32) -> (i32, i32) {
    %c0_i32 = arith.constant 0 : i32
    %c0_i32_0 = arith.constant 0 : i32
    %c0_i32_1 = arith.constant 0 : i32
    return %c0_i32, %c0_i32_0 : i32, i32
  }
  func.func @transform_6(%arg0: i32) -> (i32, i32, i32) {
    %c0_i32 = arith.constant 0 : i32
    %c0_i32_0 = arith.constant 0 : i32
    %c0_i32_1 = arith.constant 0 : i32
    return %arg0, %c0_i32, %c0_i32_0 : i32, i32, i32
  }
}

</mosaic_0001>

<bundles_post_ra>
// kernel: tpu_custom_call.1
= control target key start
LH: loop header
LB: loop body
LE: loop exit
PB: predicated region body
PF: predicated region fallthrough
CT: control target
= control target key end

     0   :  { %s2056_s0 = inlined_call_operand.hbm [shape: f32[2,8,64], index: 0, kind: input, shape index: {}]   ;;  %s2057_s1 = inlined_call_operand.hbm [shape: f32[2,8,64], index: 1, kind: input, shape index: {}]   ;;  %s2058_s2 = inlined_call_operand.hbm [shape: f32[2,8,64], index: 2, kind: input, shape index: {}]   ;;  %s2059_s3 = inlined_call_operand.hbm [shape: f32[64,192], index: 3, kind: input, shape index: {}]   ;;  %s2060_s4 = inlined_call_operand.hbm [shape: f32[64,64], index: 4, kind: input, shape index: {}]   ;;  %s2061_s5 = inlined_call_operand.hbm [shape: f32[8,256], index: 5, kind: input, shape index: {}]   ;;  %s2062_s6 = inlined_call_operand.hbm [shape: f32[2,8,64], index: 6, kind: output, shape index: {}]  }
   0x1   :  { %2075 = sst [smem:[#allocation23_spill]] %s2057_s1 }
   0x2   :  { %2076 = sst [smem:[#allocation24_spill]] %s2059_s3 }
   0x3   :  { %11 = vsyncpa [#allocation3], 0 }
   0x4   :  { %13 = vsyncpa [#allocation3 + $0x1], 0 }
   0x5   :  { %14 = vsyncpa [#allocation6], 0 }
   0x6   :  { %16 = vsyncpa [#allocation6 + $0x1], 0 }
   0x7   :  { %17 = vsyncpa [#allocation9], 0 }
   0x8   :  { %18 = vsyncpa [#allocation12], 0 }
   0x9   :  { %19 = vsyncpa [#allocation4], 0 }
   0xa   :  { %21 = vsyncpa [#allocation4 + $0x1], 0  ;;  %s1711_s21 = smov 0   ;;  %s1713_s22 = smov 0  }
   0xb   :  { %s1715_s23 = smov 0   ;;  %s1717_s24 = smov 0  }
   0xc LB: > { %2077 = sst [smem:[#allocation19_spill]] %s1650_s24  ;;  %s1732_s25 = sadd.s32 4294967295, %s1650_s24   ;;  %s1650_s24 = sphi %s1717_s24, %s2105_s24   ;;  %s1646_s23 = sphi %s1715_s23, %s2109_s23   ;;  %s1642_s22 = sphi %s1713_s22, %s2108_s22   ;;  %s1638_s21 = sphi %s1711_s21, %s2107_s21  }
   0xd   : > { %s1179_s26 = sadd.s32 4294967294, %s1650_s24   ;;  %p47_p0 = scmp.ne.s32.totalorder %s1642_s22, %s1638_s21 }
   0xe   : > { %p2064_p1 = scmp.eq.s32.totalorder %s1732_s25, 0  ;;  %p186_p2 = scmp.eq.s32.totalorder %s1732_s25, 1 }
   0xf   : > { %p192_p3 = scmp.eq.s32.totalorder %s1179_s26, 1  ;;  %p1180_p5 = scmp.ge.s32.totalorder %s1650_s24, 1 }
  0x10   : > { %p1741_p4 = por %p2064_p1, %p47_p0  ;;  %p199_p7 = scmp.lt.s32.totalorder %s1650_s24, 3 }
  0x11   : > { %p1746_p6 = por %p192_p3, %p47_p0  ;;  %s1652_s30 = smov [#allocation8]  }
  0x12   : > { %s2078_s27 = scalar_select %p1741_p4, 1, 0 }
  0x13   : > { %s2079_s28 = scalar_select %p1746_p6, 1, 0 }
  0x14   : > { %p1751_p8 = pnand %p1180_p5, %p199_p7  ;;  %s211_s7 = sshll.u32 %s1652_s30, 4  ;;  %s212_s7 = int_to_ptr.vmem [resolvable:$true] %s211_s7 }
  0x15   : > { %2080 = sst [smem:[#allocation20_spill]] %s2079_s28  ;;  %s1765_s9 = sadd.s32 1, %s1650_s24  }
  0x16   : > { %s2081_s29 = scalar_select %p1751_p8, 1, 0 }
  0x17   : > { %p1312_p9 = pneg %p1751_p8  ;;  %2083 = sst [smem:[#allocation21_spill]] %s1765_s9 }
  0x18   : > { %s34_s10 = sadd.s32 1, %s1646_s23  ;;  %s31_s11 = ssub.s32 %s1650_s24, %s1765_s9 }
  0x19   : > { %p1760_p11 = pnand %p1312_p9, %p2064_p1  ;;  %s1423_s12 = scalar_lea.vmem %s212_s7, 2048 }
  0x1a   : > { %p1424_p13 = scmp.ne.s32.totalorder %s212_s7, %s1423_s12  ;;  %p1431_p5 = scmp.lt.s32.totalorder %s212_s7, %s212_s7 }
  0x1b   : > { %s2082_s8 = scalar_select %p1760_p11, 1, 0 }
  0x1c   : > { %p2065_p12 = pneg %p1760_p11  ;;  %p1432_p7 = scmp.lt.s32.totalorder %s1423_s12, %s1423_s12 }
  0x1e   : > { %p1426_p0 = pnand %p1424_p13, %p2065_p12  ;;  %p1433_p9 = por %p1432_p7, %p1431_p5 }
  0x20   : > { %p1427_p3 = pneg %p1426_p0 }
  0x22   : > { %p1434_p10 = pnand %p1433_p9, %p1427_p3 }
  0x24   : > { %1437 = shalt.err (!%p1434_p10)
}
  0x25   : > { %s1653_s13 = smov 256   ;;  %s1654_s14 = smov 16  }
  0x26   : > { %s2084_s3 = sld [smem:[#allocation24_spill]]  ;;  %p32_p13 = scmp.eq.s32.totalorder %s31_s11, 0 }
  0x27   : > { %p41_p10 = scmp.ne.s32.totalorder %s1646_s23, %s1642_s22  ;;  %p42_p0 = scmp.eq.s32.totalorder %s1650_s24, 0 }
  0x28   : > { %p1339_p3 = scmp.lt.s32.totalorder %s1650_s24, 2  ;;  %s2063_s19 = sand.u32 1, %s1646_s23  }
  0x29   : > { %s1785_s17 = scalar_select %p32_p13, %s1646_s23, %s34_s10  }
  0x2a   : > { %p43_p5 = por %p42_p0, %p41_p10  ;;  %p1789_p7 = por %p186_p2, %p41_p10 }
  0x2b   : > { %2085 = sst [smem:[#allocation22_spill]] %s1785_s17  ;;  %s1795_s20 = sshll.u32 %s1650_s24, 7 }
  0x2c   : > { %1315 = dma.hbm_to_vmem [thread:$0]  (!%p1760_p11), %s2084_s3, 2048, %s212_s7, [#allocation9], %s1653_s13, %s1653_s13, %s1654_s14  }
  0x2d   : > { %s2086_s18 = scalar_select %p1789_p7, 1, 0 }
  0x2e   : > { %s1799_s26 = sshll.u32 %s2063_s19, 3  ;;  %p1801_p9 = pnand %p1339_p3, %p43_p5 }
  0x2f   : > { %s267_s7 = sand.u32 1, %s1650_s24   ;;  %s2088_s1 = sld [smem:[#allocation23_spill]] }
  0x30   : > { %s271_s13 = scalar_lea.vmem [#allocation5], %s1799_s26  ;;  %s1813_s15 = scalar_lea.sflag [#allocation6], %s267_s7 }
  0x31   : > { %s278_s14 = sshll.u32 %s271_s13, 4  ;;  %p1819_p13 = pneg %p1801_p9  ;;  %s279_s14 = int_to_ptr.vmem [resolvable:$true] %s278_s14 }
  0x35   : > { %s1810_s12 = scalar_lea.hbm %s2088_s1, %s1795_s20  ;;  %s1443_s3 = scalar_lea.hbm %s2088_s1, 256 }
  0x36   : > { %s1438_s16 = scalar_lea.hbm %s1810_s12, 128  ;;  %p1444_p3 = scmp.lt.s32.totalorder %s1810_s12, %s2088_s1 }
  0x37   : > { %p1439_p2 = scmp.ne.s32.totalorder %s1810_s12, %s1438_s16  ;;  %p1445_p5 = scmp.lt.s32.totalorder %s1443_s3, %s1438_s16 }
  0x39   : > { %p1441_p10 = pnand %p1819_p13, %p1439_p2  ;;  %p1446_p1 = por %p1445_p5, %p1444_p3 }
  0x3b   : > { %p1442_p0 = pneg %p1441_p10 }
  0x3d   : > { %p1447_p12 = pnand %p1446_p1, %p1442_p0 }
  0x3f   : > { %1450 = shalt.err (!%p1447_p12)
}
  0x40   : > { %s1451_s7 = scalar_lea.vmem %s279_s14, 128  ;;  %s1655_s9 = smov [#allocation5]  }
  0x41   : > { %p1452_p6 = scmp.ne.s32.totalorder %s279_s14, %s1451_s7  ;;  %s1456_s24 = sshll.u32 %s1655_s9, 4  ;;  %s1457_s24 = int_to_ptr.vmem [resolvable:$false] %s1456_s24 }
  0x42   : > { %s1458_s28 = scalar_lea.vmem %s1457_s24, 256  ;;  %p1459_p2 = scmp.lt.s32.totalorder %s279_s14, %s1457_s24 }
  0x43   : > { %p1454_p7 = pnand %p1452_p6, %p1819_p13  ;;  %p1460_p10 = scmp.lt.s32.totalorder %s1458_s28, %s1451_s7 }
  0x45   : > { %p1455_p4 = pneg %p1454_p7  ;;  %p1461_p8 = por %p1460_p10, %p1459_p2 }
  0x47   : > { %p1462_p11 = pnand %p1461_p8, %p1455_p4 }
  0x49   : > { %1465 = shalt.err (!%p1462_p11)
}
  0x4a   : > { %1328 = dma.hbm_to_vmem [thread:$0]  (!%p1801_p9), %s1810_s12, 128, %s279_s14, %s1813_s15  }
  0x4b   : > { %s1656_s3 = smov [#allocation10]   ;;  %p2090_p6 = scmp.ne.s32.totalorder %s2082_s8, 0 }
  0x4c   : > { %s224_s17 = sshll.u32 %s1656_s3, 4  ;;  %s225_s17 = int_to_ptr.vmem [resolvable:$true] %s224_s17 }
  0x4d   : > { %s1477_s16 = scalar_lea.vmem %s225_s17, 1024  ;;  %p2091_p12 = pneg %p2090_p6 }
  0x4e   : > { %p1478_p1 = scmp.ne.s32.totalorder %s225_s17, %s1477_s16  ;;  %p1485_p3 = scmp.lt.s32.totalorder %s225_s17, %s225_s17 }
  0x4f   : > { %p1486_p5 = scmp.lt.s32.totalorder %s1477_s16, %s1477_s16 }
  0x50   : > { %p1480_p7 = pnand %p1478_p1, %p2091_p12 }
  0x51   : > { %p1487_p2 = por %p1486_p5, %p1485_p3 }
  0x52   : > { %p1481_p0 = pneg %p1480_p7 }
  0x54   : > { %p1488_p4 = pnand %p1487_p2, %p1481_p0 }
  0x56   : > { %1491 = shalt.err (!%p1488_p4)
}
  0x57   : > { %s1657_s24 = smov 128   ;;  %s1658_s28 = smov 8  }
  0x58   : > { %1318 = dma.hbm_to_vmem [thread:$0]  (!%p2090_p6), %s2060_s4, 1024, %s225_s17, [#allocation9], %s1657_s24, %s1657_s24, %s1658_s28  }
  0x59   : > { %s1659_s14 = smov [#allocation11]   ;;  %s1850_s7 = scalar_lea.hbm %s2056_s0, %s1795_s20 }
  0x5a   : > { %s238_s10 = sshll.u32 %s1659_s14, 4  ;;  %p2092_p11 = pmov %p2091_p12  ;;  %s239_s10 = int_to_ptr.vmem [resolvable:$true] %s238_s10 }
  0x5b   : > { %s1503_s3 = scalar_lea.vmem %s239_s10, 256  ;;  %p1511_p12 = scmp.lt.s32.totalorder %s239_s10, %s239_s10 }
  0x5c   : > { %p1504_p8 = scmp.ne.s32.totalorder %s239_s10, %s1503_s3  ;;  %p1512_p7 = scmp.lt.s32.totalorder %s1503_s3, %s1503_s3 }
  0x5e   : > { %p1506_p10 = pnand %p1504_p8, %p2092_p11  ;;  %p1513_p0 = por %p1512_p7, %p1511_p12 }
  0x60   : > { %p1507_p1 = pneg %p1506_p10 }
  0x62   : > { %p1514_p3 = pnand %p1513_p0, %p1507_p1 }
  0x64   : > { %1517 = shalt.err (!%p1514_p3)
}
  0x65   : > { %1321 = dma.hbm_to_vmem [thread:$0]  (!%p2090_p6), %s2061_s5, 256, %s239_s10, [#allocation12]  }
  0x66   : > { %s253_s24 = scalar_lea.vmem [#allocation2], %s1799_s26  ;;  %s1865_s14 = scalar_lea.hbm %s2058_s2, %s1795_s20 }
  0x67   : > { %s260_s28 = sshll.u32 %s253_s24, 4  ;;  %s2093_s8 = sand.u32 1, %s1646_s23   ;;  %s261_s28 = int_to_ptr.vmem [resolvable:$true] %s260_s28 }
  0x68   : > { %s250_s11 = scalar_lea.sflag [#allocation3], %s2093_s8  ;;  %s1518_s13 = scalar_lea.hbm %s1850_s7, 128 }
  0x69   : > { %p1519_p5 = scmp.ne.s32.totalorder %s1850_s7, %s1518_s13  ;;  %s1523_s16 = scalar_lea.hbm %s2056_s0, 256 }
  0x6a   : > { %p1524_p6 = scmp.lt.s32.totalorder %s1850_s7, %s2056_s0  ;;  %p1525_p8 = scmp.lt.s32.totalorder %s1523_s16, %s1518_s13 }
  0x6b   : > { %p1521_p2 = pnand %p1519_p5, %p1819_p13 }
  0x6c   : > { %p1526_p11 = por %p1525_p8, %p1524_p6 }
  0x6d   : > { %p1522_p4 = pneg %p1521_p2 }
  0x6f   : > { %p1527_p10 = pnand %p1526_p11, %p1522_p4 }
  0x71   : > { %1530 = shalt.err (!%p1527_p10)
}
  0x72   : > { %s1531_s20 = scalar_lea.vmem %s261_s28, 128  ;;  %s1660_s24 = smov [#allocation2]  }
  0x73   : > { %p1532_p1 = scmp.ne.s32.totalorder %s261_s28, %s1531_s20  ;;  %s1536_s9 = sshll.u32 %s1660_s24, 4  ;;  %s1537_s9 = int_to_ptr.vmem [resolvable:$false] %s1536_s9 }
  0x74   : > { %s1538_s12 = scalar_lea.vmem %s1537_s9, 256  ;;  %p1539_p0 = scmp.lt.s32.totalorder %s261_s28, %s1537_s9 }
  0x75   : > { %p1534_p12 = pnand %p1532_p1, %p1819_p13  ;;  %p1540_p3 = scmp.lt.s32.totalorder %s1538_s12, %s1531_s20 }
  0x77   : > { %p1535_p7 = pneg %p1534_p12  ;;  %p1541_p5 = por %p1540_p3, %p1539_p0 }
  0x79   : > { %p1542_p2 = pnand %p1541_p5, %p1535_p7 }
  0x7b   : > { %1545 = shalt.err (!%p1542_p2)
}
  0x7c   : > { %1325 = dma.hbm_to_vmem [thread:$0]  (!%p1801_p9), %s1850_s7, 128, %s261_s28, %s250_s11  }
  0x7d   : > { %s289_s1 = scalar_lea.vmem [#allocation7], %s1799_s26  ;;  %s1546_s13 = scalar_lea.hbm %s1865_s14, 128 }
  0x7e   : > { %s296_s8 = sshll.u32 %s289_s1, 4  ;;  %p1547_p4 = scmp.ne.s32.totalorder %s1865_s14, %s1546_s13  ;;  %s297_s8 = int_to_ptr.vmem [resolvable:$true] %s296_s8 }
  0x7f   : > { %s1551_s16 = scalar_lea.hbm %s2058_s2, 256  ;;  %p1552_p11 = scmp.lt.s32.totalorder %s1865_s14, %s2058_s2 }
  0x80   : > { %p1549_p6 = pnand %p1547_p4, %p1819_p13  ;;  %p1553_p10 = scmp.lt.s32.totalorder %s1551_s16, %s1546_s13 }
  0x82   : > { %p1550_p8 = pneg %p1549_p6  ;;  %p1554_p1 = por %p1553_p10, %p1552_p11 }
  0x84   : > { %p1555_p12 = pnand %p1554_p1, %p1550_p8 }
  0x86   : > { %1558 = shalt.err (!%p1555_p12)
}
  0x87   : > { %s1559_s26 = scalar_lea.vmem %s297_s8, 128  ;;  %s1661_s7 = smov [#allocation7]  }
  0x88   : > { %p1560_p7 = scmp.ne.s32.totalorder %s297_s8, %s1559_s26  ;;  %s1564_s28 = sshll.u32 %s1661_s7, 4  ;;  %s1565_s28 = int_to_ptr.vmem [resolvable:$false] %s1564_s28 }
  0x89   : > { %s1566_s11 = scalar_lea.vmem %s1565_s28, 256  ;;  %p1567_p5 = scmp.lt.s32.totalorder %s297_s8, %s1565_s28 }
  0x8a   : > { %p1562_p0 = pnand %p1560_p7, %p1819_p13  ;;  %p1568_p2 = scmp.lt.s32.totalorder %s1566_s11, %s1559_s26 }
  0x8c   : > { %p1563_p3 = pneg %p1562_p0  ;;  %p1569_p4 = por %p1568_p2, %p1567_p5 }
  0x8e   : > { %p1570_p6 = pnand %p1569_p4, %p1563_p3 }
  0x90   : > { %1573 = shalt.err (!%p1570_p6)
}
  0x91   : > { %1331 = dma.hbm_to_vmem [thread:$0]  (!%p1801_p9), %s1865_s14, 128, %s297_s8, %s1813_s15  }
  0x92   : > { %p2094_p8 = scmp.ne.s32.totalorder %s2081_s29, 0 }
  0x93   : > { %s1906_s19 = sand.u32 (!%p2094_p8), 1, %s1642_s22   ;;  %p2095_p13 = scmp.ne.s32.totalorder (!%p2094_p8), %s2078_s27, 0 }
  0x94   : > { %305 = sbr.rel (%p2094_p8) target bundleno = 1823 (0x71f), region = 44  ;;  %s1192_s24 = sshll.u32 (!%p2094_p8), %s1906_s19, 3 }
  0x95   : > { %s308_s9 = scalar_lea.sflag (!%p2094_p8), [#allocation3], %s1906_s19  ;;  %s1912_s12 = scalar_lea.vmem (!%p2094_p8), [#allocation2], %s1192_s24 }
  0x99   : > { %1617 = dma.done.wait (%p2095_p13), %s308_s9, 128  }
  0x9a   : > { %1619 = vsyncadd (%p2095_p13), %s308_s9, 4294967168  ;;  %s316_s29 = sand.u32 1, %s1732_s25  }
  0x9b   : > { %s317_s30 = scalar_lea.sflag [#allocation6], %s316_s29 }
  0x9c   : > { %1621 = dma.done.wait (%p2095_p13), %s317_s30, 256  }
  0x9d   : > { %1623 = vsyncadd (%p2095_p13), %s317_s30, 4294967040  ;;  %p2096_p9 = scmp.eq.s32.totalorder %s1732_s25, 0 }
  0x9f   : > { %1625 = dma.done.wait (%p2096_p9), [#allocation9], 3072   ;;  %p2097_p11 = pmov %p2096_p9 }
  0xa0   : > { %p2098_p10 = pmov %p2096_p9 }
  0xa1   : > { %1627 = vsyncadd (%p2097_p11), [#allocation9], 4294964224 }
  0xa2   : > { %1629 = dma.done.wait (%p2098_p10), [#allocation12], 256   ;;  %p2099_p1 = pmov %p2096_p9 }
  0xa3   : > { %v1662_v0 = vmov 0   ;;  %v395_v1 = vld [vmem:[#allocation8 + $0x68] sm:$0xff]  ;;  %v397_v2 = vld [vmem:[#allocation8 + $0x78] sm:$0xff]  ;;  %v394_v3 = vld [vmem:[#allocation8 + $0x60] sm:$0xff]  ;;  %vm407_vm0 = vcmask 523264   ;;  %v1663_v27 = vmov 0.0   ;;  %v458_v34 = vlaneseq }
  0xa4   : > { %1631 = vsyncadd (%p2099_p1), [#allocation12], 4294967040  ;;  %443 = vmatprep.mubr.bf16.mxu0 %v1662_v0  ;;  %v405_v4 = vpack.c.bf16 %v397_v2, %v395_v1  ;;  %v396_v5 = vld [vmem:[#allocation8 + $0x70] sm:$0xff]  ;;  %v391_v6 = vld [vmem:[#allocation8 + $0x48] sm:$0xff]  ;;  %1232 = vmatprep.subr.bf16.mxu1 %v1663_v27  ;;  %s1664_s27 = smov 127   ;;  %vm767_vm1 = vcmask 1043456  }
  0xa5   : > { %v393_v7 = vld [vmem:[#allocation8 + $0x58] sm:$0xff]  ;;  %v404_v8 = vpack.c.bf16 %v396_v5, %v394_v3  ;;  %v390_v10 = vld [vmem:[#allocation8 + $0x40] sm:$0xff]  ;;  %v392_v11 = vld [vmem:[#allocation8 + $0x50] sm:$0xff]  ;;  %s1665_s15 = smov 1   ;;  %v1941_v35 = vand.u32 127, %v458_v34  ;;  %vm1666_vm3 = vmmov 0  }
  0xa6   : > { %v403_v9 = vpack.c.bf16 %v393_v7, %v391_v6  ;;  %v387_v12 = vld [vmem:[#allocation8 + $0x28] sm:$0xff]  ;;  %419 = vmatprep.subr.bf16.mxu0 %v405_v4  ;;  %v389_v13 = vld [vmem:[#allocation8 + $0x38] sm:$0xff]  ;;  %v402_v14 = vpack.c.bf16 %v392_v11, %v390_v10  ;;  %v386_v16 = vld [vmem:[#allocation8 + $0x20] sm:$0xff]  ;;  %1234 = vmatprep.mubr.msk.bf16.mxu1 %vm1666_vm3, %v1663_v27  ;;  %s1667_s14 = smov 80   ;;  %s1668_s1 = smov 112   ;;  %vm509_vm4 = vcmask 130048  }
  0xa7   : > { %420 = vmatpush1.bf16.msra.mxu0 %v404_v8  ;;  %v401_v15 = vpack.c.bf16 %v389_v13, %v387_v12  ;;  %v388_v17 = vld [vmem:[#allocation8 + $0x30] sm:$0xff]  ;;  %v383_v18 = vld [vmem:[#allocation8 + $0x8] sm:$0xff]  ;;  %v385_v19 = vld [vmem:[#allocation8 + $0x18] sm:$0xff]  ;;  %v464_v36 = vand.u32 1, %v1941_v35  ;;  %s1669_s8 = smov 96   ;;  %s1670_s13 = smov 64  }
  0xa8   : > { %421 = vmatprep.subr.bf16.mxu0 %v403_v9  ;;  %v400_v20 = vpack.c.bf16 %v388_v17, %v386_v16  ;;  %v399_v21 = vpack.c.bf16 %v385_v19, %v383_v18  ;;  %v382_v22 = vld [vmem:[#allocation8] sm:$0xff]  ;;  %v384_v23 = vld [vmem:[#allocation8 + $0x10] sm:$0xff]  ;;  %v453_v40 = vld [vmem:[#allocation11 + $0x8] sm:$0xff]  ;;  %v708_v61 = vshrl.u32 %v458_v34, 7  ;;  %v1671_v63 = vmov -1e+09  }
  0xa9   : > { %v398_v24 = vpack.c.bf16 %v384_v23, %v382_v22  ;;  %v381_v25 = vld [vmem:[%s1912_s12] sm:$0xff]  ;;  %vm472_vm2 = vcmp.eq.s32.totalorder %v464_v36, 0  ;;  %v452_v38 = vld [vmem:[#allocation11] sm:$0xff]  ;;  %vm715_vm6 = vcmask 64512   ;;  %s1672_s3 = smov 16   ;;  %s1673_s17 = smov 32  }
  0xaa   : > { %v406_v26 = vpack.c.bf16 %v381_v25, %v381_v25  ;;  %vm709_vm5 = vcmp.le.s32.totalorder %v1941_v35, %v708_v61  ;;  %s1674_s16 = smov 48   ;;  %vm962_vm7 = vcmask 261120   ;;  %vm964_vm8 = vcmask 392192   ;;  %s1208_s10 = sshll.u32 %s1732_s25, 7 }
  0xab   : > { %422 = vmatpush1.bf16.msra.mxu0 %v402_v14  ;;  %v710_v0 = vsel %vm709_vm5, 0.0, %v1671_v63  ;;  %s379_s20 = scalar_lea.vmem [#allocation13], %s1192_s24  ;;  %s2012_s11 = scalar_lea.hbm %s2062_s6, %s1208_s10 }
  0xac   : > { %423 = vmatprep.subr.bf16.mxu0 %v401_v15  ;;  %s1037_s26 = sshll.u32 %s379_s20, 4  ;;  %s1024_s9 = scalar_lea.sflag [#allocation4], %s1906_s19  ;;  %s2014_s26 = int_to_ptr.vmem [resolvable:$true] %s1037_s26 }
  0xad   : > { %s1574_s12 = scalar_lea.vmem %s2014_s26, 128  ;;  %p2100_p7 = scmp.ne.s32.totalorder %s2086_s18, 0 }
  0xae   : > { %p1575_p12 = scmp.ne.s32.totalorder %s2014_s26, %s1574_s12  ;;  %s1675_s25 = smov [#allocation13]  }
  0xaf   : > { %424 = vmatpush1.bf16.msra.mxu0 %v400_v20  ;;  %s1578_s24 = sshll.u32 %s1675_s25, 4  ;;  %s1579_s24 = int_to_ptr.vmem [resolvable:$false] %s1578_s24 }
  0xb0   : > { %425 = vmatprep.subr.bf16.mxu0 %v399_v21  ;;  %p1576_p0 = pnand %p1575_p12, %p2100_p7  ;;  %s1580_s29 = scalar_lea.vmem %s1579_s24, 256 }
  0xb1   : > { %p1581_p5 = scmp.lt.s32.totalorder %s2014_s26, %s1579_s24  ;;  %p1582_p2 = scmp.lt.s32.totalorder %s1580_s29, %s1574_s12 }
  0xb2   : > { %p1577_p3 = pneg %p1576_p0 }
  0xb3   : > { %426 = vmatpush1.bf16.msra.mxu0 %v398_v24  ;;  %p1583_p4 = por %p1582_p2, %p1581_p5 }
  0xb4   : > { %1256 = vmatprep.subr.bf16.mxu0 %v1663_v27 }
  0xb5   : > { %p1584_p6 = pnand %p1583_p4, %p1577_p3 }
  0xb6   : > { %1197 = vmatmul.mubr.msk.bf16.vlgmr.msra.gmra.mxu0 %vm407_vm0, %v406_v26 }
  0xb7   : > { %1258 = vmatprep.mubr.msk.bf16.mxu0 %vm1666_vm3, %v1663_v27 }
 0x176   : > { %v445_v28 = vpop.f32.mrf.mxu0 }
 0x177   : > { %454 = vrot.lane.b32.xlu0 %v445_v28, %s1664_s27  ;;  %v475_v43 = vmul.f32 %v452_v38, %v445_v28 }
 0x178   : > { %v1935_v29 = vpop.f32.mrf.mxu0 }
 0x179   : > { %v502_v30 = vpack.c.bf16 %v1935_v29, %v1935_v29 }
 0x17a   : > { %v449_v31 = vpop.f32.mrf.mxu0 }
 0x17b   : > { %456 = vrot.lane.b32.xlu0 %v445_v28, %s1665_s15  ;;  %v769_v32 = vsel %vm767_vm1, %v502_v30, 0 }
 0x17c   : > { %v450_v33 = vpop.f32.mrf.mxu0  ;;  %1257 = vmatpush3.bf16.msra.mxu0 %v769_v32 }
 0x17d   : > { %1268 = vmatprep.subr.bf16.mxu0 %v1663_v27 }
 0x1e9   : > { %v455_v37 = vpop.permute.xlu0 %454 }
 0x1ea   : > { %v473_v39 = vsub.f32 0.0, %v455_v37 }
 0x1ed   : > { %v457_v41 = vpop.permute.xlu0 %456 }
 0x1ee   : > { %v474_v42 = vsel %vm472_vm2, %v473_v39, %v457_v41 }
 0x1ef   : > { %v476_v44 = vmul.f32 %v474_v42, %v453_v40 }
 0x1f1   : > { %v477_v45 = vadd.f32 %v476_v44, %v475_v43 }
 0x1f3   : > { %485 = vrot.lane.b32.xlu0 %v477_v45, %s1667_s14  ;;  %479 = vrot.lane.b32.xlu1 %v477_v45, %s1668_s1  ;;  %v488_v46 = vpack.c.bf16 %v477_v45, %v477_v45 }
 0x1f7   : > { %482 = vrot.lane.b32.xlu1 %v477_v45, %s1669_s8 }
 0x1fb   : > { %507 = vrot.lane.b32.xlu1 %v488_v46, %s1670_s13 }
 0x265   : > { %v480_v47 = vpop.permute.xlu1 %479  ;;  %v486_v49 = vpop.permute.xlu0 %485 }
 0x266   : > { %v489_v48 = vpack.c.bf16 %v480_v47, %v480_v47  ;;  %v491_v51 = vpack.c.bf16 %v486_v49, %v486_v49 }
 0x268   : > { %557 = vrot.lane.b32.xlu0 %v489_v48, %s1670_s13 }
 0x269   : > { %v483_v50 = vpop.permute.xlu1 %482 }
 0x26a   : > { %v490_v52 = vpack.c.bf16 %v483_v50, %v483_v50 }
 0x26c   : > { %655 = vrot.lane.b32.xlu0 %v491_v51, %s1670_s13  ;;  %606 = vrot.lane.b32.xlu1 %v490_v52, %s1670_s13 }
 0x26d   : > { %v508_v53 = vpop.permute.xlu1 %507 }
 0x26e   : > { %v514_v54 = vsel %vm509_vm4, %v508_v53, 0 }
 0x26f   : > { %1233 = vmatpush3.bf16.xpose.msra.mxu1 %v514_v54 }
 0x270   : > { %1238 = vmatprep.subr.bf16.mxu1 %v1663_v27 }
 0x276   : > { %1235 = vmatmul.mubr.msk.bf16.vlgmr.msra.gmra.mxu1 %vm509_vm4, %v488_v46 }
 0x277   : > { %1240 = vmatprep.mubr.msk.bf16.mxu1 %vm1666_vm3, %v1663_v27 }
 0x2da   : > { %v558_v55 = vpop.permute.xlu0 %557 }
 0x2db   : > { %v563_v56 = vsel %vm509_vm4, %v558_v55, 0 }
 0x2dc   : > { %1239 = vmatpush3.bf16.xpose.msra.mxu1 %v563_v56 }
 0x2dd   : > { %1244 = vmatprep.subr.bf16.mxu1 %v1663_v27 }
 0x2de   : > { %v607_v57 = vpop.permute.xlu1 %606  ;;  %v656_v59 = vpop.permute.xlu0 %655 }
 0x2df   : > { %v612_v58 = vsel %vm509_vm4, %v607_v57, 0  ;;  %v661_v60 = vsel %vm509_vm4, %v656_v59, 0 }
 0x2e3   : > { %1241 = vmatmul.mubr.msk.bf16.vlgmr.msra.gmra.mxu1 %vm509_vm4, %v489_v48 }
 0x2e4   : > { %1245 = vmatpush3.bf16.xpose.msra.mxu1 %v612_v58  ;;  %1246 = vmatprep.mubr.msk.bf16.mxu1 %vm1666_vm3, %v1663_v27 }
 0x2e5   : > { %1250 = vmatprep.subr.bf16.mxu1 %v1663_v27 }
 0x2eb   : > { %1247 = vmatmul.mubr.msk.bf16.vlgmr.msra.gmra.mxu1 %vm509_vm4, %v490_v52 }
 0x2ec   : > { %1251 = vmatpush3.bf16.xpose.msra.mxu1 %v661_v60  ;;  %1252 = vmatprep.mubr.msk.bf16.mxu1 %vm1666_vm3, %v1663_v27 }
 0x2ed   : > { %1262 = vmatprep.subr.bf16.mxu1 %v1663_v27 }
 0x2f3   : > { %1253 = vmatmul.mubr.msk.bf16.vlgmr.msra.gmra.mxu1 %vm509_vm4, %v491_v51 }
 0x2f4   : > { %1264 = vmatprep.mubr.msk.bf16.mxu1 %vm1666_vm3, %v1663_v27 }
 0x336   : > { %v550_v62 = vpop.f32.mrf.mxu1 }
 0x337   : > { %v703_v1 = vmul.f32 0.25, %v550_v62 }
 0x338   : > { %v1236_v2 = vpop.f32.mrf.mxu1 }
 0x339   : > { %v711_v3 = vadd.f32 %v710_v0, %v703_v1 }
 0x33a   : > { %v553_v4 = vpop.f32.mrf.mxu1 }
 0x33b   : > { %v716_v5 = vsel %vm715_vm6, %v711_v3, -inf }
 0x33c   : > { %717 = vmax.xlane.f32.xlu1 %v716_v5  ;;  %v1237_v6 = vpop.f32.mrf.mxu1 }
 0x3a3   : > { %v599_v7 = vpop.f32.mrf.mxu1 }
 0x3a4   : > { %v704_v8 = vmul.f32 0.25, %v599_v7 }
 0x3a5   : > { %v1242_v9 = vpop.f32.mrf.mxu1 }
 0x3a6   : > { %v712_v10 = vadd.f32 %v710_v0, %v704_v8 }
 0x3a7   : > { %v602_v11 = vpop.f32.mrf.mxu1 }
 0x3a8   : > { %v719_v12 = vsel %vm715_vm6, %v712_v10, -inf }
 0x3a9   : > { %720 = vmax.xlane.f32.xlu0 %v719_v12  ;;  %v1243_v13 = vpop.f32.mrf.mxu1 }
 0x3ab   : > { %v648_v14 = vpop.f32.mrf.mxu1 }
 0x3ac   : > { %v705_v15 = vmul.f32 0.25, %v648_v14  ;;  %v973_v14 = vld [vmem:[#allocation10 + $0x30] sm:$0xff] }
 0x3ad   : > { %v1248_v16 = vpop.f32.mrf.mxu1 }
 0x3ae   : > { %v713_v17 = vadd.f32 %v710_v0, %v705_v15  ;;  %v974_v15 = vld [vmem:[#allocation10 + $0x38] sm:$0xff]  ;;  %v971_v16 = vld [vmem:[#allocation10 + $0x20] sm:$0xff] }
 0x3af   : > { %v651_v18 = vpop.f32.mrf.mxu1 }
 0x3b0   : > { %v722_v19 = vsel %vm715_vm6, %v713_v17, -inf  ;;  %v972_v18 = vld [vmem:[#allocation10 + $0x28] sm:$0xff] }
 0x3b1   : > { %723 = vmax.xlane.f32.xlu0 %v722_v19  ;;  %v1249_v20 = vpop.f32.mrf.mxu1  ;;  %v977_v19 = vpack.c.bf16 %v972_v18, %v971_v16 }
 0x3b3   : > { %v697_v21 = vpop.f32.mrf.mxu1 }
 0x3b4   : > { %v706_v22 = vmul.f32 0.25, %v697_v21  ;;  %v969_v21 = vld [vmem:[#allocation10 + $0x10] sm:$0xff] }
 0x3b5   : > { %v1254_v23 = vpop.f32.mrf.mxu1 }
 0x3b6   : > { %v714_v24 = vadd.f32 %v710_v0, %v706_v22  ;;  %v970_v22 = vld [vmem:[#allocation10 + $0x18] sm:$0xff] }
 0x3b7   : > { %v700_v25 = vpop.f32.mrf.mxu1 }
 0x3b8   : > { %v725_v26 = vsel %vm715_vm6, %v714_v24, -inf }
 0x3b9   : > { %726 = vmax.xlane.f32.xlu1 %v725_v26  ;;  %v1255_v28 = vpop.f32.mrf.mxu1 }
 0x3c5   : > { %v718_v30 = vpop.xlane.xlu1 %717 }
 0x3c6   : > { %v728_v31 = vsub.f32 %v711_v3, %v718_v30 }
 0x3c8   : > { %v732_v32 = vmul.f32 1.442695, %v728_v31 }
 0x3ca   : > { %1396 = vpow2.f32 %v732_v32 }
 0x3d7   : > { %v1397_v33 = vpop.eup %1396 }
 0x3d8   : > { %v740_v34 = vsel %vm715_vm6, %v1397_v33, 0.0 }
 0x3d9   : > { %741 = vadd.xlane.f32.xlu0 %v740_v34  ;;  %v968_v34 = vld [vmem:[#allocation10 + $0x8] sm:$0xff] }
 0x432   : > { %v721_v35 = vpop.xlane.xlu0 %720 }
 0x433   : > { %v729_v36 = vsub.f32 %v712_v10, %v721_v35 }
 0x435   : > { %v734_v37 = vmul.f32 1.442695, %v729_v36 }
 0x437   : > { %1398 = vpow2.f32 %v734_v37 }
 0x43a   : > { %v724_v38 = vpop.xlane.xlu0 %723 }
 0x43b   : > { %v730_v39 = vsub.f32 %v713_v17, %v724_v38  ;;  %v978_v17 = vpack.c.bf16 %v974_v15, %v973_v14 }
 0x43d   : > { %v736_v40 = vmul.f32 1.442695, %v730_v39 }
 0x43f   : > { %1400 = vpow2.f32 %v736_v40 }
 0x442   : > { %v727_v45 = vpop.xlane.xlu1 %726 }
 0x443   : > { %v731_v46 = vsub.f32 %v714_v24, %v727_v45  ;;  %v976_v24 = vpack.c.bf16 %v970_v22, %v969_v21 }
 0x444   : > { %v1399_v41 = vpop.eup %1398 }
 0x445   : > { %v743_v42 = vsel %vm715_vm6, %v1399_v41, 0.0  ;;  %v738_v48 = vmul.f32 1.442695, %v731_v46 }
 0x446   : > { %744 = vadd.xlane.f32.xlu1 %v743_v42 }
 0x44c   : > { %v1401_v43 = vpop.eup %1400 }
 0x44d   : > { %v746_v44 = vsel %vm715_vm6, %v1401_v43, 0.0 }
 0x44e   : > { %747 = vadd.xlane.f32.xlu0 %v746_v44 }
 0x457   : > { %496 = vrot.lane.b32.xlu1 %v1935_v29, %s1669_s8 }
 0x462   : > { %v742_v47 = vpop.xlane.xlu0 %741 }
 0x463   : > { %1402 = vrcp.f32 %v742_v47 }
 0x464   : > { %493 = vrot.lane.b32.xlu0 %v1935_v29, %s1668_s1  ;;  %1404 = vpow2.f32 %v738_v48 }
 0x470   : > { %v1403_v49 = vpop.eup %1402 }
 0x471   : > { %v753_v50 = vmul.f32 %v1403_v49, %v1397_v33  ;;  %v1405_v52 = vpop.eup %1404  ;;  %v967_v33 = vld [vmem:[#allocation10] sm:$0xff] }
 0x472   : > { %v749_v53 = vsel %vm715_vm6, %v1405_v52, 0.0  ;;  %v975_v35 = vpack.c.bf16 %v968_v34, %v967_v33 }
 0x473   : > { %v760_v51 = vpack.c.bf16 %v753_v50, %v753_v50 }
 0x475   : > { %1259 = vmatmul.mubr.msk.bf16.vlgmr.msra.gmra.mxu0 %vm715_vm6, %v760_v51 }
 0x476   : > { %1270 = vmatprep.mubr.msk.bf16.mxu0 %vm1666_vm3, %v1663_v27 }
 0x47b   : > { %750 = vadd.xlane.f32.xlu1 %v749_v53 }
 0x48c   : > { %499 = vrot.lane.b32.xlu1 %v1935_v29, %s1667_s14 }
 0x4cf   : > { %v745_v54 = vpop.xlane.xlu1 %744 }
 0x4d0   : > { %1406 = vrcp.f32 %v745_v54 }
 0x4d3   : > { %v497_v55 = vpop.permute.xlu1 %496 }
 0x4d4   : > { %v504_v56 = vpack.c.bf16 %v497_v55, %v497_v55 }
 0x4d6   : > { %v861_v57 = vsel %vm767_vm1, %v504_v56, 0 }
 0x4d7   : > { %v748_v58 = vpop.xlane.xlu0 %747  ;;  %1269 = vmatpush3.bf16.msra.mxu0 %v861_v57 }
 0x4d8   : > { %1408 = vrcp.f32 %v748_v58  ;;  %1280 = vmatprep.subr.bf16.mxu0 %v1663_v27 }
 0x4db   : > { %v494_v59 = vpop.permute.xlu0 %493 }
 0x4dc   : > { %v503_v60 = vpack.c.bf16 %v494_v59, %v494_v59 }
 0x4dd   : > { %v1407_v61 = vpop.eup %1406 }
 0x4de   : > { %v815_v62 = vsel %vm767_vm1, %v503_v60, 0  ;;  %v755_v63 = vmul.f32 %v1407_v61, %v1399_v41 }
 0x4df   : > { %1263 = vmatpush3.bf16.msra.mxu1 %v815_v62 }
 0x4e0   : > { %v761_v0 = vpack.c.bf16 %v755_v63, %v755_v63  ;;  %1274 = vmatprep.subr.bf16.mxu1 %v1663_v27 }
 0x4e2   : > { %1265 = vmatmul.mubr.msk.bf16.vlgmr.msra.gmra.mxu1 %vm715_vm6, %v761_v0 }
 0x4e3   : > { %1276 = vmatprep.mubr.msk.bf16.mxu1 %vm1666_vm3, %v1663_v27 }
 0x4e5   : > { %v1409_v29 = vpop.eup %1408 }
 0x4e6   : > { %v757_v1 = vmul.f32 %v1409_v29, %v1401_v43 }
 0x4e8   : > { %v762_v2 = vpack.c.bf16 %v757_v1, %v757_v1 }
 0x4ea   : > { %1271 = vmatmul.mubr.msk.bf16.vlgmr.msra.gmra.mxu0 %vm715_vm6, %v762_v2 }
 0x4eb   : > { %1288 = vmatprep.mubr.msk.bf16.mxu0 %vm1666_vm3, %v1663_v27  ;;  %1281 = vmatpush3.bf16.msra.mxu0 %v978_v17 }
 0x4ec   : > { %1282 = vmatprep.subr.bf16.mxu0 %v1663_v27 }
 0x4ef   : > { %1283 = vmatpush3.bf16.msra.mxu0 %v977_v19 }
 0x4f0   : > { %1284 = vmatprep.subr.bf16.mxu0 %v1663_v27 }
 0x4f3   : > { %1285 = vmatpush3.bf16.msra.mxu0 %v976_v24 }
 0x4f4   : > { %1286 = vmatprep.subr.bf16.mxu0 %v1663_v27 }
 0x4f7   : > { %1287 = vmatpush3.bf16.msra.mxu0 %v975_v35 }
 0x504   : > { %v751_v3 = vpop.xlane.xlu1 %750 }
 0x505   : > { %1410 = vrcp.f32 %v751_v3 }
 0x508   : > { %v500_v4 = vpop.permute.xlu1 %499 }
 0x509   : > { %v505_v5 = vpack.c.bf16 %v500_v4, %v500_v4 }
 0x50b   : > { %v907_v6 = vsel %vm767_vm1, %v505_v5, 0 }
 0x50c   : > { %1275 = vmatpush3.bf16.msra.mxu1 %v907_v6 }
 0x512   : > { %v1411_v7 = vpop.eup %1410 }
 0x513   : > { %v759_v8 = vmul.f32 %v1411_v7, %v1405_v52 }
 0x515   : > { %v763_v9 = vpack.c.bf16 %v759_v8, %v759_v8 }
 0x517   : > { %1277 = vmatmul.mubr.msk.bf16.vlgmr.msra.gmra.mxu1 %vm715_vm6, %v763_v9 }
 0x535   : > { %v805_v10 = vpop.f32.mrf.mxu0 }
 0x537   : > { %v1260_v11 = vpop.f32.mrf.mxu0 }
 0x539   : > { %v808_v12 = vpop.f32.mrf.mxu0 }
 0x53b   : > { %v1261_v13 = vpop.f32.mrf.mxu0 }
 0x5a2   : > { %v851_v20 = vpop.f32.mrf.mxu1 }
 0x5a3   : > { %950 = vrot.lane.b32.xlu0 %v851_v20, %s1672_s3 }
 0x5a4   : > { %v1266_v23 = vpop.f32.mrf.mxu1 }
 0x5a6   : > { %v854_v25 = vpop.f32.mrf.mxu1 }
 0x5a8   : > { %v1267_v26 = vpop.f32.mrf.mxu1 }
 0x5aa   : > { %v897_v28 = vpop.f32.mrf.mxu0 }
 0x5ab   : > { %954 = vrot.lane.b32.xlu1 %v897_v28, %s1673_s17 }
 0x5ac   : > { %v1272_v30 = vpop.f32.mrf.mxu0 }
 0x5ae   : > { %v900_v31 = vpop.f32.mrf.mxu0 }
 0x5b0   : > { %v1273_v32 = vpop.f32.mrf.mxu0 }
 0x5d7   : > { %v943_v36 = vpop.f32.mrf.mxu1 }
 0x5d8   : > { %958 = vrot.lane.b32.xlu0 %v943_v36, %s1674_s16 }
 0x5d9   : > { %v1278_v37 = vpop.f32.mrf.mxu1 }
 0x5db   : > { %v946_v38 = vpop.f32.mrf.mxu1 }
 0x5dd   : > { %v1279_v39 = vpop.f32.mrf.mxu1 }
 0x615   : > { %v951_v40 = vpop.permute.xlu0 %950 }
 0x616   : > { %v961_v41 = vsel %vm509_vm4, %v805_v10, %v951_v40 }
 0x61d   : > { %v955_v27 = vpop.permute.xlu1 %954 }
 0x61e   : > { %v963_v42 = vsel %vm962_vm7, %v961_v41, %v955_v27 }
 0x64a   : > { %v959_v43 = vpop.permute.xlu0 %958 }
 0x64b   : > { %v965_v44 = vsel %vm964_vm8, %v963_v42, %v959_v43 }
 0x64c   : > { %v966_v45 = vpack.c.bf16 %v965_v44, %v965_v44 }
 0x64e   : > { %1289 = vmatmul.mubr.msk.bf16.vlgmr.msra.gmra.mxu0 %vm407_vm0, %v966_v45 }
 0x70e   : > { %v1016_v46 = vpop.f32.mrf.mxu0 }
 0x70f   : > { %1022 = vst.msk [vmem:[%s379_s20] sm:$0xff] %vm407_vm0, %v1016_v46 }
 0x710   : > { %v1290_v47 = vpop.f32.mrf.mxu0 }
 0x711   : > { %1587 = shalt.err (!%p1584_p6)
}
 0x712   : > { %s1588_s30 = scalar_lea.hbm %s2012_s11, 128  ;;  %s1592_s15 = scalar_lea.hbm %s2062_s6, 256 }
 0x713   : > { %p1589_p8 = scmp.ne.s32.totalorder %s2012_s11, %s1588_s30  ;;  %p1593_p11 = scmp.lt.s32.totalorder %s2012_s11, %s2062_s6 }
 0x714   : > { %p1594_p10 = scmp.lt.s32.totalorder %s1592_s15, %s1588_s30 }
 0x715   : > { %p1590_p13 = pnand %p1589_p8, %p2100_p7 }
 0x716   : > { %p1595_p1 = por %p1594_p10, %p1593_p11 }
 0x717   : > { %p1591_p9 = pneg %p1590_p13 }
 0x719   : > { %p1596_p12 = pnand %p1595_p1, %p1591_p9 }
 0x71b   : > { %1599 = shalt.err (!%p1596_p12)
}
 0x71c   : > { %1310 = dma.vmem_to_hbm [thread:$0]  (%p2100_p7), %s2014_s26, 128, %s2012_s11, %s1024_s9   ;;  %v1019_v48 = vpop.f32.mrf.mxu0 }
 0x71e   : > { %v1291_v49 = vpop.f32.mrf.mxu0 }
 0x71f PF: > { %s2101_s8 = sld [smem:[#allocation20_spill]]  ;;  %s1049_s3 = sand.u32 1, %s1638_s21  }
 0x720   : > { %s2102_s13 = sld [smem:[#allocation19_spill]]  ;;  %s1050_s17 = scalar_lea.sflag [#allocation4], %s1049_s3 }
 0x725   : > { %p2103_p0 = scmp.ne.s32.totalorder %s2101_s8, 0 }
 0x726   : > { %p2104_p3 = scmp.ge.s32.totalorder %s2102_s13, 2 }
 0x728   : > { %p1333_p5 = pnand %p2104_p3, %p2103_p0 }
 0x72a   : > { %p1334_p2 = pneg %p1333_p5 }
 0x72c   : > { %1633 = dma.done.wait (%p1334_p2), %s1050_s17, 128  }
 0x72d   : > { %1635 = vsyncadd (%p1334_p2), %s1050_s17, 4294967168  ;;  %s2105_s24 = sld [smem:[#allocation21_spill]]  ;;  %s2107_s21 = smov %s1642_s22 }
 0x72e   : > { %s2106_s18 = sld [smem:[#allocation22_spill]]  ;;  %s2108_s22 = smov %s1646_s23 }
 0x733   : > { %p24_p7 = scmp.ge.s32.totalorder %s2105_s24, 4  }
 0x734   : > { %s2109_s23 = smov %s2106_s18 }
 0x735   :  { %26 = sbr.rel (!%p24_p7) target bundleno = 12 (0xc), region = 125 }
 0x73a   :  { %1055 = vsyncpa [#allocation3], 1 }
 0x73b   :  { %1057 = vsyncpa [#allocation3 + $0x1], 1 }
 0x73c   :  { %1058 = vsyncpa [#allocation6], 1 }
 0x73d   :  { %1060 = vsyncpa [#allocation6 + $0x1], 1 }
 0x73e   :  { %1061 = vsyncpa [#allocation9], 1 }
 0x73f   :  { %1062 = vsyncpa [#allocation12], 1 }
 0x740   :  { %1063 = vsyncpa [#allocation4], 1 }
 0x741   :  { %1065 = vsyncpa [#allocation4 + $0x1], 1 }

</bundles_post_ra>
